<compile_context>
chip_gen: v6e
topology: v6e:2x2x1
jax: 0.10.0
libtpu: 0.0.40
codegen_flags: <defaults>
</compile_context>

<pallas_src>
import jax
import jax.numpy as jnp
from jax.experimental import pallas as pl
from jax.experimental.pallas import tpu as pltpu


# Conservative per-TensorCore budgets valid across v5e / v6e (128 MiB physical)
# and v7x (64 MiB physical per TC).  Sizing target < scoped limit < physical.
_VMEM_SIZING_BUDGET = 40 * 1024 * 1024
_VMEM_LIMIT_BYTES = 48 * 1024 * 1024


def _round_up(x, m):
    return ((x + m - 1) // m) * m


# ----------------------------------------------------------------------------
# Kernel bodies
# ----------------------------------------------------------------------------
def _mlp_kernel_fused(x_ref, w1_ref, b1_ref, w2_ref, b2_ref, o_ref):
    """Single-K path: whole reduction in one step, w1 fully VMEM-resident."""
    # relu1 in f32 (v5e VPU has no bf16), cast to bf16 for the MXU operand.
    x = jnp.maximum(x_ref[...], 0.0).astype(jnp.bfloat16)
    h = jnp.dot(x, w1_ref[...], preferred_element_type=jnp.float32) + b1_ref[...]
    # do1 is an inplace Dropout -> identity at inference.
    # TODO(synk): training-mode dropout (pltpu.prng_random_bits mask) not implemented.
    h = jnp.maximum(h, 0.0).astype(jnp.bfloat16)  # relu2
    o_ref[...] = (
        jnp.dot(h, w2_ref[...], preferred_element_type=jnp.float32) + b2_ref[...]
    )


def _mlp_kernel_ktiled(x_ref, w1_ref, b1_ref, w2_ref, b2_ref, o_ref, acc_ref):
    """K-tiled path for large F*D: f32 VMEM accumulator, reduction axis last."""
    k = pl.program_id(1)

    @pl.when(k == 0)
    def _init():
        acc_ref[...] = jnp.zeros_like(acc_ref)

    x = jnp.maximum(x_ref[...], 0.0).astype(jnp.bfloat16)
    acc_ref[...] += jnp.dot(x, w1_ref[...], preferred_element_type=jnp.float32)

    @pl.when(k == pl.num_programs(1) - 1)
    def _finalize():
        h = acc_ref[...] + b1_ref[...]              # fc1 bias (f32)
        h = jnp.maximum(h, 0.0).astype(jnp.bfloat16)  # relu2 (dropout = identity)
        o_ref[...] = (
            jnp.dot(h, w2_ref[...], preferred_element_type=jnp.float32) + b2_ref[...]
        )


# ----------------------------------------------------------------------------
# Tiling policy
# ----------------------------------------------------------------------------
def _vmem_bytes(tile_b, tile_k, bottleneck, c_pad, single_k):
    """Estimated peak VMEM, counting double-buffering on every pallas operand."""
    x_t = 2 * tile_b * tile_k * 4                 # f32 input tile
    w1_t = 2 * tile_k * bottleneck * 2            # bf16 w1 tile
    w2_t = 2 * bottleneck * c_pad * 2             # bf16 w2 (resident)
    bias = 2 * (bottleneck + c_pad) * 4           # b1 / b2
    out_t = 2 * tile_b * c_pad * 4                # f32 output tile
    acc = 0 if single_k else tile_b * bottleneck * 4
    return x_t + w1_t + w2_t + bias + out_t + acc


def _choose_tile_b(B):
    if B <= 32:
        return _round_up(B, 8)
    # 16-aligned (bf16 sublane packing), cap 256 (MXU width); aim for >=2
    # programs on the parallel batch axis so v7x's two TensorCores both work.
    return min(256, _round_up(pl.cdiv(B, 2), 16))


def _choose_tile_k(in_dim_pad, tile_b, bottleneck, c_pad):
    # Collapse the reduction axis (w1 streamed from HBM exactly once) whenever
    # it fits the budget; otherwise largest 128-multiple divisor that fits.
    if _vmem_bytes(tile_b, in_dim_pad, bottleneck, c_pad, True) <= _VMEM_SIZING_BUDGET:
        return in_dim_pad
    best = 128
    t = 256
    while t < in_dim_pad:
        if (in_dim_pad % t == 0
                and _vmem_bytes(tile_b, t, bottleneck, c_pad, False) <= _VMEM_SIZING_BUDGET):
            best = t
        t += 128
    return best


# ----------------------------------------------------------------------------
# Parameter prep + forward
# ----------------------------------------------------------------------------
def prepare_params(w1, b1, w2, b2):
    """One-time prep: cast weights to bf16, pad in_dim and num_class to 128 multiples.

    w1: (F*D, 512), b1: (512,), w2: (512, num_class), b2: (num_class,).
    Returns (w1_pad bf16 [in_dim_pad,512], b1 f32 [1,512],
             w2_pad bf16 [512,c_pad], b2_pad f32 [1,c_pad]).
    """
    # TODO(synk): optional int8 (v5e/v6e) / fp8 (v7x) w1 quantization with
    # dequant-in-epilogue would halve the dominant weight HBM stream.
    in_dim, bottleneck = w1.shape
    num_class = w2.shape[1]
    in_dim_pad = _round_up(in_dim, 128)
    c_pad = _round_up(num_class, 128)

    w1_pad = (
        jnp.zeros((in_dim_pad, bottleneck), jnp.bfloat16)
        .at[:in_dim, :].set(w1.astype(jnp.bfloat16))
    )
    b1_2d = b1.reshape(1, bottleneck).astype(jnp.float32)
    w2_pad = (
        jnp.zeros((bottleneck, c_pad), jnp.bfloat16)
        .at[:, :num_class].set(w2.astype(jnp.bfloat16))
    )
    b2_pad = (
        jnp.zeros((1, c_pad), jnp.float32)
        .at[:, :num_class].set(b2.astype(jnp.float32))
    )
    return w1_pad, b1_2d, w2_pad, b2_pad


def mlp_module_forward(x, params, *, num_frames, img_feature_dim, num_class,
                       tile_b=None, tile_k=None, return_padded=False):
    """x: (B, num_frames, img_feature_dim) float32; params from prepare_params.

    Returns (B, num_class) float32 (or the padded (B_pad, c_pad) slab when
    return_padded=True and the consumer can accept it).
    """
    w1, b1, w2, b2 = params
    B = x.shape[0]
    in_dim = num_frames * img_feature_dim
    in_dim_pad, bottleneck = w1.shape
    c_pad = w2.shape[1]
    assert in_dim_pad % 128 == 0 and in_dim <= in_dim_pad
    assert c_pad % 128 == 0 and num_class <= c_pad

    if tile_b is None:
        tile_b = _choose_tile_b(B)
    assert tile_b % 8 == 0, "tile_b must be a multiple of 8 (f32 sublane)"
    b_pad = _round_up(B, tile_b)

    if tile_k is None:
        tile_k = _choose_tile_k(in_dim_pad, tile_b, bottleneck, c_pad)
    assert tile_k % 128 == 0 and in_dim_pad % tile_k == 0, (
        "tile_k must be a multiple of 128 that divides the padded in_dim "
        f"({in_dim_pad}); got {tile_k}"
    )
    single_k = tile_k == in_dim_pad

    x_flat = x.reshape(B, in_dim)
    if b_pad != B or in_dim_pad != in_dim:
        x_flat = jnp.pad(x_flat, ((0, b_pad - B), (0, in_dim_pad - in_dim)))

    compiler_params = pltpu.CompilerParams(
        dimension_semantics=("parallel",) if single_k else ("parallel", "arbitrary"),
        vmem_limit_bytes=_VMEM_LIMIT_BYTES,
    )
    out_shape = jax.ShapeDtypeStruct((b_pad, c_pad), jnp.float32)

    if single_k:
        out_padded = pl.pallas_call(
            _mlp_kernel_fused,
            out_shape=out_shape,
            grid=(b_pad // tile_b,),
            in_specs=[
                pl.BlockSpec((tile_b, tile_k), lambda i: (i, 0)),
                pl.BlockSpec((tile_k, bottleneck), lambda i: (0, 0)),
                pl.BlockSpec((1, bottleneck), lambda i: (0, 0)),
                pl.BlockSpec((bottleneck, c_pad), lambda i: (0, 0)),
                pl.BlockSpec((1, c_pad), lambda i: (0, 0)),
            ],
            out_specs=pl.BlockSpec((tile_b, c_pad), lambda i: (i, 0)),
            compiler_params=compiler_params,
        )(x_flat, w1, b1, w2, b2)
    else:
        out_padded = pl.pallas_call(
            _mlp_kernel_ktiled,
            out_shape=out_shape,
            grid=(b_pad // tile_b, in_dim_pad // tile_k),
            in_specs=[
                pl.BlockSpec((tile_b, tile_k), lambda i, k: (i, k)),
                pl.BlockSpec((tile_k, bottleneck), lambda i, k: (k, 0)),
                pl.BlockSpec((1, bottleneck), lambda i, k: (0, 0)),
                pl.BlockSpec((bottleneck, c_pad), lambda i, k: (0, 0)),
                pl.BlockSpec((1, c_pad), lambda i, k: (0, 0)),
            ],
            out_specs=pl.BlockSpec((tile_b, c_pad), lambda i, k: (i, 0)),
            scratch_shapes=[pltpu.VMEM((tile_b, bottleneck), jnp.float32)],
            compiler_params=compiler_params,
        )(x_flat, w1, b1, w2, b2)

    if return_padded or (b_pad == B and c_pad == num_class):
        return out_padded
    return out_padded[:B, :num_class]


def init_params(key, num_frames, img_feature_dim, num_bottleneck, num_class):
    """Deterministic synthetic init mimicking nn.Linear's uniform fan-in init (f32)."""
    in_dim = num_frames * img_feature_dim
    k1, k2, k3, k4 = jax.random.split(key, 4)
    bound1 = 1.0 / (in_dim ** 0.5)
    bound2 = 1.0 / (num_bottleneck ** 0.5)
    # Stored as (in_features, out_features) == PyTorch weight.T
    w1 = jax.random.uniform(k1, (in_dim, num_bottleneck), jnp.float32, -bound1, bound1)
    b1 = jax.random.uniform(k2, (num_bottleneck,), jnp.float32, -bound1, bound1)
    w2 = jax.random.uniform(k3, (num_bottleneck, num_class), jnp.float32, -bound2, bound2)
    b2 = jax.random.uniform(k4, (num_class,), jnp.float32, -bound2, bound2)
    return w1, b1, w2, b2


if __name__ == "__main__":
    # batch=8, num_frames=8, img_feature_dim=32 -> flattened 256; bottleneck=512.
    B, F, D = 8, 8, 32
    NUM_BOTTLENECK = 512
    NUM_CLASS = 16

    key = jax.random.PRNGKey(0)
    k_x, k_p = jax.random.split(key)
    x = jax.random.normal(k_x, (B, F, D), jnp.float32)
    w1, b1, w2, b2 = init_params(k_p, F, D, NUM_BOTTLENECK, NUM_CLASS)
    params = prepare_params(w1, b1, w2, b2)

    # Default policy -> single-K fused kernel (w1 fully VMEM-resident, 1 grid step).
    out = mlp_module_forward(
        x, params, num_frames=F, img_feature_dim=D, num_class=NUM_CLASS
    )
    out = jax.block_until_ready(out)
    assert out.shape == (B, NUM_CLASS) and out.dtype == jnp.float32

    # Also exercise the K-tiled accumulator path (forced tile_k=128 -> 2 steps).
    out_tiled = mlp_module_forward(
        x, params, num_frames=F, img_feature_dim=D, num_class=NUM_CLASS, tile_k=128
    )
    out_tiled = jax.block_until_ready(out_tiled)
    assert jnp.allclose(out, out_tiled, atol=1e-3, rtol=1e-3), float(
        jnp.abs(out - out_tiled).max()
    )

    # Reference 1: same bf16 quantization points as the kernel (tight tolerance).
    x_flat = x.reshape(B, F * D)
    xr = jnp.maximum(x_flat, 0.0).astype(jnp.bfloat16).astype(jnp.float32)
    h = xr @ w1.astype(jnp.bfloat16).astype(jnp.float32) + b1
    h = jnp.maximum(h, 0.0).astype(jnp.bfloat16).astype(jnp.float32)
    ref_bf16 = h @ w2.astype(jnp.bfloat16).astype(jnp.float32) + b2
    assert jnp.allclose(out, ref_bf16, atol=1e-3, rtol=1e-3), float(
        jnp.abs(out - ref_bf16).max()
    )

    # Reference 2: pure-f32 PyTorch-equivalent forward (looser tolerance, bf16 weights).
    h32 = jnp.maximum(jnp.maximum(x_flat, 0.0) @ w1 + b1, 0.0)
    ref_f32 = h32 @ w2 + b2
    assert jnp.allclose(out, ref_f32, atol=5e-2, rtol=5e-2), float(
        jnp.abs(out - ref_f32).max()
    )

    print("KERNEL_OK")
</pallas_src>

<mosaic_0001>
module attributes {stable_mosaic.version = 11 : i64} {
  func.func @_mlp_kernel_fused(%arg0: i32, %arg1: memref<8x256xf32, #tpu.memory_space<vmem>>, %arg2: memref<256x512xbf16, #tpu.memory_space<vmem>>, %arg3: memref<1x512xf32, #tpu.memory_space<vmem>>, %arg4: memref<512x128xbf16, #tpu.memory_space<vmem>>, %arg5: memref<1x128xf32, #tpu.memory_space<vmem>>, %arg6: memref<8x128xf32, #tpu.memory_space<vmem>>) attributes {dimension_semantics = [#tpu.dimension_semantics<parallel>], iteration_bounds = array<i64: 1>, scalar_prefetch = 0 : i64, scratch_operands = 0 : i64, tpu.core_type = #tpu.core_type<tc>, window_params = [{transform_indices = @transform_0, window_bounds = array<i64: 8, 256>}, {pipeline_mode = #tpu.pipeline_mode<synchronous>, transform_indices = @transform_1, window_bounds = array<i64: 256, 512>}, {pipeline_mode = #tpu.pipeline_mode<synchronous>, transform_indices = @transform_2, window_bounds = array<i64: 1, 512>}, {pipeline_mode = #tpu.pipeline_mode<synchronous>, transform_indices = @transform_3, window_bounds = array<i64: 512, 128>}, {pipeline_mode = #tpu.pipeline_mode<synchronous>, transform_indices = @transform_4, window_bounds = array<i64: 1, 128>}, {transform_indices = @transform_5, window_bounds = array<i64: 8, 128>}]} {
    %c0 = arith.constant 0 : index
    %c0_0 = arith.constant 0 : index
    %0 = vector.load %arg1[%c0, %c0_0] : memref<8x256xf32, #tpu.memory_space<vmem>>, vector<8x256xf32>
    %cst = arith.constant 0.000000e+00 : f32
    %1 = vector.broadcast %cst : f32 to vector<8x256xf32>
    %2 = arith.maximumf %0, %1 : vector<8x256xf32>
    %3 = arith.truncf %2 : vector<8x256xf32> to vector<8x256xbf16>
    %c0_1 = arith.constant 0 : index
    %c0_2 = arith.constant 0 : index
    %4 = vector.load %arg2[%c0_1, %c0_2] : memref<256x512xbf16, #tpu.memory_space<vmem>>, vector<256x512xbf16>
    %cst_3 = arith.constant dense<0.000000e+00> : vector<8x512xf32>
    %5 = tpu.matmul %3, %4, %cst_3 {dimension_numbers = #tpu.dot_dimension_numbers<[1], [0], [0], [1], [0, 0, 1, 1], [], []>} : vector<8x256xbf16>, vector<256x512xbf16>, vector<8x512xf32> -> vector<8x512xf32>
    %c0_4 = arith.constant 0 : index
    %c0_5 = arith.constant 0 : index
    %6 = vector.load %arg3[%c0_4, %c0_5] : memref<1x512xf32, #tpu.memory_space<vmem>>, vector<1x512xf32>
    %7 = vector.broadcast %6 : vector<1x512xf32> to vector<8x512xf32>
    %8 = arith.addf %5, %7 : vector<8x512xf32>
    %cst_6 = arith.constant 0.000000e+00 : f32
    %9 = vector.broadcast %cst_6 : f32 to vector<8x512xf32>
    %10 = arith.maximumf %8, %9 : vector<8x512xf32>
    %11 = arith.truncf %10 : vector<8x512xf32> to vector<8x512xbf16>
    %c0_7 = arith.constant 0 : index
    %c0_8 = arith.constant 0 : index
    %12 = vector.load %arg4[%c0_7, %c0_8] : memref<512x128xbf16, #tpu.memory_space<vmem>>, vector<512x128xbf16>
    %cst_9 = arith.constant dense<0.000000e+00> : vector<8x128xf32>
    %13 = tpu.matmul %11, %12, %cst_9 {dimension_numbers = #tpu.dot_dimension_numbers<[1], [0], [0], [1], [0, 0, 1, 1], [], []>} : vector<8x512xbf16>, vector<512x128xbf16>, vector<8x128xf32> -> vector<8x128xf32>
    %c0_10 = arith.constant 0 : index
    %c0_11 = arith.constant 0 : index
    %14 = vector.load %arg5[%c0_10, %c0_11] : memref<1x128xf32, #tpu.memory_space<vmem>>, vector<1x128xf32>
    %15 = vector.broadcast %14 : vector<1x128xf32> to vector<8x128xf32>
    %16 = arith.addf %13, %15 : vector<8x128xf32>
    %c0_12 = arith.constant 0 : index
    %c0_13 = arith.constant 0 : index
    %17 = vector.load %arg6[%c0_12, %c0_13] : memref<8x128xf32, #tpu.memory_space<vmem>>, vector<8x128xf32>
    tpu.vector_store %arg6[%c0_12, %c0_13], %16 {strides = array<i32>} : memref<8x128xf32, #tpu.memory_space<vmem>>, vector<8x128xf32>,
    return
  }
  func.func @transform_0(%arg0: i32) -> (i32, i32) {
    %c0_i32 = arith.constant 0 : i32
    %c0_i32_0 = arith.constant 0 : i32
    return %arg0, %c0_i32 : i32, i32
  }
  func.func @transform_1(%arg0: i32) -> (i32, i32) {
    %c0_i32 = arith.constant 0 : i32
    %c0_i32_0 = arith.constant 0 : i32
    %c0_i32_1 = arith.constant 0 : i32
    return %c0_i32, %c0_i32_0 : i32, i32
  }
  func.func @transform_2(%arg0: i32) -> (i32, i32) {
    %c0_i32 = arith.constant 0 : i32
    %c0_i32_0 = arith.constant 0 : i32
    %c0_i32_1 = arith.constant 0 : i32
    return %c0_i32, %c0_i32_0 : i32, i32
  }
  func.func @transform_3(%arg0: i32) -> (i32, i32) {
    %c0_i32 = arith.constant 0 : i32
    %c0_i32_0 = arith.constant 0 : i32
    %c0_i32_1 = arith.constant 0 : i32
    return %c0_i32, %c0_i32_0 : i32, i32
  }
  func.func @transform_4(%arg0: i32) -> (i32, i32) {
    %c0_i32 = arith.constant 0 : i32
    %c0_i32_0 = arith.constant 0 : i32
    %c0_i32_1 = arith.constant 0 : i32
    return %c0_i32, %c0_i32_0 : i32, i32
  }
  func.func @transform_5(%arg0: i32) -> (i32, i32) {
    %c0_i32 = arith.constant 0 : i32
    %c0_i32_0 = arith.constant 0 : i32
    return %arg0, %c0_i32 : i32, i32
  }
}

</mosaic_0001>

<bundles_post_ra>
// kernel: tpu_custom_call.1
= control target key start
LH: loop header
LB: loop body
LE: loop exit
PB: predicated region body
PF: predicated region fallthrough
CT: control target
= control target key end

     0   :  { %10 = vsyncpa [#allocation3], 0  ;;  %s1379_s0 = inlined_call_operand.hbm [shape: f32[8,256], index: 0, kind: input, shape index: {}]   ;;  %s1380_s1 = inlined_call_operand.hbm [shape: bf16[256,512], index: 1, kind: input, shape index: {}]   ;;  %s1381_s2 = inlined_call_operand.hbm [shape: f32[1,512], index: 2, kind: input, shape index: {}]   ;;  %s1382_s3 = inlined_call_operand.hbm [shape: bf16[512,128], index: 3, kind: input, shape index: {}]   ;;  %s1383_s4 = inlined_call_operand.vmem [shape: f32[1,128], index: 4, kind: input, shape index: {}]   ;;  %s1384_s5 = inlined_call_operand.hbm [shape: f32[8,128], index: 5, kind: output, shape index: {}]  }
   0x1   :  { %11 = vsyncpa [#allocation6], 0 }
   0x2   :  { %12 = vsyncpa [#allocation9], 0 }
   0x3   :  { %13 = vsyncpa [#allocation4], 0  ;;  %s1322_s18 = smov [#allocation5]  }
   0x4   :  { %s29_s19 = sshll.u32 %s1322_s18, 4  ;;  %s30_s19 = int_to_ptr.vmem [resolvable:$true] %s29_s19 }
   0x5   :  { %s1222_s20 = scalar_lea.vmem %s30_s19, 8192  ;;  %p1227_p1 = scmp.lt.s32.totalorder %s30_s19, %s30_s19 }
   0x6   :  { %p1223_p0 = scmp.ne.s32.totalorder %s30_s19, %s1222_s20  ;;  %p1228_p2 = scmp.lt.s32.totalorder %s1222_s20, %s1222_s20 }
   0x8   :  { %p1229_p3 = por %p1228_p2, %p1227_p1 }
   0xa   :  { %p1230_p4 = pnand %p1229_p3, %p1223_p0 }
   0xc   :  { %1233 = shalt.err (!%p1230_p4)
}
   0xd   :  { %s1323_s21 = smov 256   ;;  %s1324_s22 = smov 16  }
   0xe   :  { %35 = dma.hbm_to_vmem [thread:$0]  %s1380_s1, 8192, %s30_s19, [#allocation6], %s1323_s21, %s1323_s21, %s1324_s22  }
   0xf   :  { %s1325_s25 = smov [#allocation2]   ;;  %s1326_s27 = smov [#allocation7]  }
  0x10   :  { %s20_s26 = sshll.u32 %s1325_s25, 4  ;;  %s42_s28 = sshll.u32 %s1326_s27, 4  ;;  %s21_s26 = int_to_ptr.vmem [resolvable:$true] %s20_s26  ;;  %s43_s28 = int_to_ptr.vmem [resolvable:$true] %s42_s28 }
  0x11   :  { %s1242_s29 = scalar_lea.vmem %s21_s26, 256  ;;  %p1247_p6 = scmp.lt.s32.totalorder %s21_s26, %s21_s26 }
  0x12   :  { %p1243_p5 = scmp.ne.s32.totalorder %s21_s26, %s1242_s29  ;;  %p1248_p7 = scmp.lt.s32.totalorder %s1242_s29, %s1242_s29 }
  0x14   :  { %p1249_p8 = por %p1248_p7, %p1247_p6 }
  0x16   :  { %p1250_p9 = pnand %p1249_p8, %p1243_p5 }
  0x18   :  { %1253 = shalt.err (!%p1250_p9)
}
  0x19   :  { %23 = dma.hbm_to_vmem [thread:$0]  %s1379_s0, 256, %s21_s26, [#allocation3]  }
  0x1a   :  { %s1262_s7 = scalar_lea.vmem %s43_s28, 64  ;;  %p1267_p11 = scmp.lt.s32.totalorder %s43_s28, %s43_s28 }
  0x1b   :  { %p1263_p10 = scmp.ne.s32.totalorder %s43_s28, %s1262_s7  ;;  %p1268_p12 = scmp.lt.s32.totalorder %s1262_s7, %s1262_s7 }
  0x1d   :  { %p1269_p13 = por %p1268_p12, %p1267_p11 }
  0x1f   :  { %p1270_p0 = pnand %p1269_p13, %p1263_p10 }
  0x21   :  { %1273 = shalt.err (!%p1270_p0)
}
  0x22   :  { %45 = dma.hbm_to_vmem [thread:$0]  %s1381_s2, 64, %s43_s28, [#allocation6]  }
  0x23   :  { %s1327_s9 = smov [#allocation8]  }
  0x24   :  { %s51_s10 = sshll.u32 %s1327_s9, 4  ;;  %s52_s10 = int_to_ptr.vmem [resolvable:$true] %s51_s10 }
  0x25   :  { %s1282_s11 = scalar_lea.vmem %s52_s10, 4096  ;;  %p1287_p2 = scmp.lt.s32.totalorder %s52_s10, %s52_s10 }
  0x26   :  { %p1283_p1 = scmp.ne.s32.totalorder %s52_s10, %s1282_s11  ;;  %p1288_p3 = scmp.lt.s32.totalorder %s1282_s11, %s1282_s11 }
  0x28   :  { %p1289_p4 = por %p1288_p3, %p1287_p2 }
  0x2a   :  { %p1290_p5 = pnand %p1289_p4, %p1283_p1 }
  0x2c   :  { %1293 = shalt.err (!%p1290_p5)
}
  0x2d   :  { %s1328_s0 = smov 64   ;;  %s1329_s12 = smov 4  }
  0x2e   :  { %57 = dma.hbm_to_vmem [thread:$0]  %s1382_s3, 4096, %s52_s10, [#allocation9], %s1328_s0, %s1328_s0, %s1329_s12  }
  0x2f   :  { %1314 = dma.done.wait [#allocation3], 256  }
  0x30   :  { %1315 = vsyncadd [#allocation3], 4294967040 }
  0x31   :  { %1316 = dma.done.wait [#allocation6], 8256  }
  0x32   :  { %1317 = vsyncadd [#allocation6], 4294959040 }
  0x33   :  { %1318 = dma.done.wait [#allocation9], 4096  }
  0x34   :  { %1319 = vsyncadd [#allocation9], 4294963200  ;;  %v1086_v0 = vld [vmem:[#allocation5 + $0xe4] ss:$16 sps:$4 sm:$0xff]   ;;  %v1088_v1 = vld [vmem:[#allocation5 + $0xec] ss:$16 sps:$4 sm:$0xff]  }
  0x35   :  { %485 = vmatprep.subr.bf16.mxu0 %v1086_v0  ;;  %v1090_v2 = vld [vmem:[#allocation5 + $0xe0] ss:$16 sps:$4 sm:$0xff]   ;;  %v1091_v3 = vld [vmem:[#allocation5 + $0xe8] ss:$16 sps:$4 sm:$0xff]   ;;  %526 = vmatprep.subr.bf16.mxu1 %v1088_v1  ;;  %v1092_v4 = vld [vmem:[#allocation5 + $0xc4] ss:$16 sps:$4 sm:$0xff]  }
  0x36   :  { %486 = vmatpush1.bf16.msra.mxu0 %v1090_v2  ;;  %527 = vmatpush1.bf16.msra.mxu1 %v1091_v3  ;;  %v1094_v5 = vld [vmem:[#allocation5 + $0xcc] ss:$16 sps:$4 sm:$0xff]   ;;  %v1096_v6 = vld [vmem:[#allocation5 + $0xc0] ss:$16 sps:$4 sm:$0xff]   ;;  %v1097_v7 = vld [vmem:[#allocation5 + $0xc8] ss:$16 sps:$4 sm:$0xff]  }
  0x37   :  { %487 = vmatprep.subr.bf16.mxu0 %v1092_v4  ;;  %528 = vmatprep.subr.bf16.mxu1 %v1094_v5  ;;  %v1098_v8 = vld [vmem:[#allocation5 + $0xa4] ss:$16 sps:$4 sm:$0xff]   ;;  %v1100_v9 = vld [vmem:[#allocation5 + $0xac] ss:$16 sps:$4 sm:$0xff]   ;;  %v1102_v10 = vld [vmem:[#allocation5 + $0xa0] ss:$16 sps:$4 sm:$0xff]  }
  0x38   :  { %v1103_v11 = vld [vmem:[#allocation5 + $0xa8] ss:$16 sps:$4 sm:$0xff]   ;;  %v1104_v12 = vld [vmem:[#allocation5 + $0x84] ss:$16 sps:$4 sm:$0xff]   ;;  %v1106_v13 = vld [vmem:[#allocation5 + $0x8c] ss:$16 sps:$4 sm:$0xff]  }
  0x39   :  { %v1108_v14 = vld [vmem:[#allocation5 + $0x80] ss:$16 sps:$4 sm:$0xff]   ;;  %v1109_v15 = vld [vmem:[#allocation5 + $0x88] ss:$16 sps:$4 sm:$0xff]   ;;  %v1110_v16 = vld [vmem:[#allocation5 + $0x64] ss:$16 sps:$4 sm:$0xff]  }
  0x3a   :  { %488 = vmatpush1.bf16.msra.mxu0 %v1096_v6  ;;  %529 = vmatpush1.bf16.msra.mxu1 %v1097_v7  ;;  %v1112_v17 = vld [vmem:[#allocation5 + $0x6c] ss:$16 sps:$4 sm:$0xff]   ;;  %v1114_v18 = vld [vmem:[#allocation5 + $0x60] ss:$16 sps:$4 sm:$0xff]   ;;  %v1115_v19 = vld [vmem:[#allocation5 + $0x68] ss:$16 sps:$4 sm:$0xff]  }
  0x3b   :  { %489 = vmatprep.subr.bf16.mxu0 %v1098_v8  ;;  %530 = vmatprep.subr.bf16.mxu1 %v1100_v9  ;;  %v1116_v20 = vld [vmem:[#allocation5 + $0x44] ss:$16 sps:$4 sm:$0xff]   ;;  %v1118_v21 = vld [vmem:[#allocation5 + $0x4c] ss:$16 sps:$4 sm:$0xff]   ;;  %v1120_v22 = vld [vmem:[#allocation5 + $0x40] ss:$16 sps:$4 sm:$0xff]  }
  0x3c   :  { %v1121_v23 = vld [vmem:[#allocation5 + $0x48] ss:$16 sps:$4 sm:$0xff]   ;;  %v1122_v24 = vld [vmem:[#allocation5 + $0x24] ss:$16 sps:$4 sm:$0xff]   ;;  %v1124_v25 = vld [vmem:[#allocation5 + $0x2c] ss:$16 sps:$4 sm:$0xff]  }
  0x3d   :  { %v1126_v26 = vld [vmem:[#allocation5 + $0x20] ss:$16 sps:$4 sm:$0xff]   ;;  %v1127_v27 = vld [vmem:[#allocation5 + $0x28] ss:$16 sps:$4 sm:$0xff]   ;;  %v1128_v28 = vld [vmem:[#allocation5 + $0x4] ss:$16 sps:$4 sm:$0xff]  }
  0x3e   :  { %490 = vmatpush1.bf16.msra.mxu0 %v1102_v10  ;;  %531 = vmatpush1.bf16.msra.mxu1 %v1103_v11  ;;  %v1130_v29 = vld [vmem:[#allocation5 + $0xc] ss:$16 sps:$4 sm:$0xff]   ;;  %v1132_v30 = vld [vmem:[#allocation5] ss:$16 sps:$4 sm:$0xff]   ;;  %v1133_v31 = vld [vmem:[#allocation5 + $0x8] ss:$16 sps:$4 sm:$0xff]  }
  0x3f   :  { %491 = vmatprep.subr.bf16.mxu0 %v1104_v12  ;;  %532 = vmatprep.subr.bf16.mxu1 %v1106_v13  ;;  %v1134_v32 = vld [vmem:[#allocation5 + $0x1e4] ss:$16 sps:$4 sm:$0xff]   ;;  %v1136_v33 = vld [vmem:[#allocation5 + $0x1ec] ss:$16 sps:$4 sm:$0xff]   ;;  %v1138_v34 = vld [vmem:[#allocation5 + $0x1e0] ss:$16 sps:$4 sm:$0xff]  }
  0x40   :  { %v1139_v35 = vld [vmem:[#allocation5 + $0x1e8] ss:$16 sps:$4 sm:$0xff]   ;;  %v1140_v36 = vld [vmem:[#allocation5 + $0x1c4] ss:$16 sps:$4 sm:$0xff]   ;;  %v1142_v37 = vld [vmem:[#allocation5 + $0x1cc] ss:$16 sps:$4 sm:$0xff]  }
  0x41   :  { %v1144_v38 = vld [vmem:[#allocation5 + $0x1c0] ss:$16 sps:$4 sm:$0xff]   ;;  %v1145_v39 = vld [vmem:[#allocation5 + $0x1c8] ss:$16 sps:$4 sm:$0xff]   ;;  %v1146_v40 = vld [vmem:[#allocation5 + $0x1a4] ss:$16 sps:$4 sm:$0xff]  }
  0x42   :  { %492 = vmatpush1.bf16.msra.mxu0 %v1108_v14  ;;  %533 = vmatpush1.bf16.msra.mxu1 %v1109_v15  ;;  %v1148_v41 = vld [vmem:[#allocation5 + $0x1ac] ss:$16 sps:$4 sm:$0xff]   ;;  %v1150_v42 = vld [vmem:[#allocation5 + $0x1a0] ss:$16 sps:$4 sm:$0xff]   ;;  %v1151_v43 = vld [vmem:[#allocation5 + $0x1a8] ss:$16 sps:$4 sm:$0xff]  }
  0x43   :  { %493 = vmatprep.subr.bf16.mxu0 %v1110_v16  ;;  %534 = vmatprep.subr.bf16.mxu1 %v1112_v17  ;;  %v1152_v44 = vld [vmem:[#allocation5 + $0x184] ss:$16 sps:$4 sm:$0xff]   ;;  %v1154_v45 = vld [vmem:[#allocation5 + $0x18c] ss:$16 sps:$4 sm:$0xff]   ;;  %v1156_v46 = vld [vmem:[#allocation5 + $0x180] ss:$16 sps:$4 sm:$0xff]  }
  0x44   :  { %v1157_v47 = vld [vmem:[#allocation5 + $0x188] ss:$16 sps:$4 sm:$0xff]   ;;  %v1158_v50 = vld [vmem:[#allocation5 + $0x164] ss:$16 sps:$4 sm:$0xff]   ;;  %v1160_v51 = vld [vmem:[#allocation5 + $0x16c] ss:$16 sps:$4 sm:$0xff]  }
  0x45   :  { %v74_v48 = vld [vmem:[#allocation2 + $0x8] sm:$0xff]  ;;  %v1162_v53 = vld [vmem:[#allocation5 + $0x160] ss:$16 sps:$4 sm:$0xff]   ;;  %v1164_v55 = vld [vmem:[#allocation5 + $0x144] ss:$16 sps:$4 sm:$0xff]   ;;  %s1330_s15 = smov [#allocation10]  }
  0x46   :  { %494 = vmatpush1.bf16.msra.mxu0 %v1114_v18  ;;  %535 = vmatpush1.bf16.msra.mxu1 %v1115_v19  ;;  %v76_v49 = vmax.f32 %v74_v48, 0.0  ;;  %v1163_v54 = vld [vmem:[#allocation5 + $0x168] ss:$16 sps:$4 sm:$0xff]   ;;  %v1166_v56 = vld [vmem:[#allocation5 + $0x14c] ss:$16 sps:$4 sm:$0xff]   ;;  %v73_v0 = vld [vmem:[#allocation2] sm:$0xff] }
  0x47   :  { %495 = vmatprep.subr.bf16.mxu0 %v1116_v20  ;;  %536 = vmatprep.subr.bf16.mxu1 %v1118_v21  ;;  %v1168_v57 = vld [vmem:[#allocation5 + $0x140] ss:$16 sps:$4 sm:$0xff]   ;;  %v1169_v58 = vld [vmem:[#allocation5 + $0x148] ss:$16 sps:$4 sm:$0xff]   ;;  %v1170_v59 = vld [vmem:[#allocation5 + $0x124] ss:$16 sps:$4 sm:$0xff]  }
  0x48   :  { %v78_v52 = vpack.c.bf16 %v76_v49, %v76_v49  ;;  %v1172_v60 = vld [vmem:[#allocation5 + $0x12c] ss:$16 sps:$4 sm:$0xff]   ;;  %v1174_v61 = vld [vmem:[#allocation5 + $0x120] ss:$16 sps:$4 sm:$0xff]   ;;  %v1175_v62 = vld [vmem:[#allocation5 + $0x128] ss:$16 sps:$4 sm:$0xff]  }
  0x49   :  { %v1176_v63 = vld [vmem:[#allocation5 + $0x104] ss:$16 sps:$4 sm:$0xff]   ;;  %v1178_v1 = vld [vmem:[#allocation5 + $0x10c] ss:$16 sps:$4 sm:$0xff]   ;;  %v1180_v2 = vld [vmem:[#allocation5 + $0x100] ss:$16 sps:$4 sm:$0xff]  }
  0x4a   :  { %496 = vmatpush1.bf16.msra.mxu0 %v1120_v22  ;;  %537 = vmatpush1.bf16.msra.mxu1 %v1121_v23  ;;  %v1181_v3 = vld [vmem:[#allocation5 + $0x108] ss:$16 sps:$4 sm:$0xff]   ;;  %v75_v4 = vmax.f32 %v73_v0, 0.0  ;;  %v1182_v5 = vld [vmem:[#allocation8 + $0x78] sm:$0xff]   ;;  %v1190_v14 = vld [vmem:[#allocation8 + $0x68] sm:$0xff]   ;;  %s925_s16 = sshll.u32 %s1330_s15, 4  ;;  %s926_s16 = int_to_ptr.vmem [resolvable:$true] %s925_s16 }
  0x4b   :  { %497 = vmatprep.subr.bf16.mxu0 %v1122_v24  ;;  %538 = vmatprep.subr.bf16.mxu1 %v1124_v25  ;;  %v1183_v6 = vld [vmem:[#allocation8 + $0xf8] sm:$0xff]   ;;  %v1186_v10 = vld [vmem:[#allocation8 + $0x70] sm:$0xff]   ;;  %v1191_v15 = vld [vmem:[#allocation8 + $0xe8] sm:$0xff]   ;;  %s1294_s17 = scalar_lea.vmem %s926_s16, 128  ;;  %p1299_p7 = scmp.lt.s32.totalorder %s926_s16, %s926_s16 }
  0x4c   :  { %517 = vmatprep.mubr.bf16.mxu0 %v78_v52  ;;  %558 = vmatprep.mubr.bf16.mxu1 %v78_v52  ;;  %v1184_v7 = vld [vmem:[#allocation8 + $0x38] sm:$0xff]   ;;  %v77_v8 = vpack.c.bf16 %v75_v4, %v75_v4  ;;  %v1187_v11 = vld [vmem:[#allocation8 + $0xf0] sm:$0xff]   ;;  %v1192_v16 = vld [vmem:[#allocation8 + $0x28] sm:$0xff]   ;;  %p1295_p6 = scmp.ne.s32.totalorder %s926_s16, %s1294_s17  ;;  %p1300_p8 = scmp.lt.s32.totalorder %s1294_s17, %s1294_s17 }
  0x4d   :  { %v1185_v9 = vld [vmem:[#allocation8 + $0xb8] sm:$0xff]   ;;  %v1188_v12 = vld [vmem:[#allocation8 + $0x30] sm:$0xff]   ;;  %v1193_v17 = vld [vmem:[#allocation8 + $0xa8] sm:$0xff]  }
  0x4e   :  { %498 = vmatpush1.bf16.msra.mxu0 %v1126_v26  ;;  %539 = vmatpush1.bf16.msra.mxu1 %v1127_v27  ;;  %v1189_v13 = vld [vmem:[#allocation8 + $0xb0] sm:$0xff]   ;;  %v1194_v18 = vld [vmem:[#allocation8 + $0x60] sm:$0xff]   ;;  %v1198_v22 = vld [vmem:[#allocation8 + $0x58] sm:$0xff]   ;;  %p1301_p9 = por %p1300_p8, %p1299_p7 }
  0x4f   :  { %499 = vmatprep.subr.bf16.mxu0 %v1128_v28  ;;  %540 = vmatprep.subr.bf16.mxu1 %v1130_v29  ;;  %v1195_v19 = vld [vmem:[#allocation8 + $0xe0] sm:$0xff]   ;;  %v1199_v23 = vld [vmem:[#allocation8 + $0xd8] sm:$0xff]   ;;  %v1202_v26 = vld [vmem:[#allocation8 + $0x50] sm:$0xff]  }
  0x50   :  { %v1196_v20 = vld [vmem:[#allocation8 + $0x20] sm:$0xff]   ;;  %v1200_v24 = vld [vmem:[#allocation8 + $0x18] sm:$0xff]   ;;  %v1203_v27 = vld [vmem:[#allocation8 + $0xd0] sm:$0xff]   ;;  %p1302_p10 = pnand %p1301_p9, %p1295_p6 }
  0x51   :  { %v1197_v21 = vld [vmem:[#allocation8 + $0xa0] sm:$0xff]   ;;  %v1201_v25 = vld [vmem:[#allocation8 + $0x98] sm:$0xff]   ;;  %v1204_v28 = vld [vmem:[#allocation8 + $0x10] sm:$0xff]  }
  0x52   :  { %500 = vmatpush1.bf16.msra.mxu0 %v1132_v30  ;;  %541 = vmatpush1.bf16.msra.mxu1 %v1133_v31  ;;  %v1205_v29 = vld [vmem:[#allocation8 + $0x90] sm:$0xff]   ;;  %v1206_v30 = vld [vmem:[#allocation8 + $0x48] sm:$0xff]  }
  0x53   :  { %501 = vmatprep.subr.bf16.mxu0 %v1134_v32  ;;  %542 = vmatprep.subr.bf16.mxu1 %v1136_v33  ;;  %v1207_v31 = vld [vmem:[#allocation8 + $0xc8] sm:$0xff]  }
  0x54   :  { %v1208_v32 = vld [vmem:[#allocation8 + $0x8] sm:$0xff]  }
  0x55   :  { %v1209_v33 = vld [vmem:[#allocation8 + $0x88] sm:$0xff]  }
  0x56   :  { %502 = vmatpush2.bf16.msra.mxu0 %v1138_v34  ;;  %543 = vmatpush2.bf16.msra.mxu1 %v1139_v35  ;;  %v1210_v34 = vld [vmem:[#allocation8 + $0x40] sm:$0xff]  }
  0x57   :  { %503 = vmatprep.subr.bf16.mxu0 %v1140_v36  ;;  %544 = vmatprep.subr.bf16.mxu1 %v1142_v37  ;;  %v1211_v35 = vld [vmem:[#allocation8 + $0xc0] sm:$0xff]  }
  0x58   :  { %v1212_v36 = vld [vmem:[#allocation8] sm:$0xff]  }
  0x59   :  { %v1213_v37 = vld [vmem:[#allocation8 + $0x80] sm:$0xff]  }
  0x5a   :  { %504 = vmatpush2.bf16.msra.mxu0 %v1144_v38  ;;  %545 = vmatpush2.bf16.msra.mxu1 %v1145_v39  ;;  %v145_v38 = vlaneseq }
  0x5b   :  { %505 = vmatprep.subr.bf16.mxu0 %v1146_v40  ;;  %546 = vmatprep.subr.bf16.mxu1 %v1148_v41 }
  0x5c   :  { %v146_v39 = vshrl.u32 %v145_v38, 7 }
  0x5e   :  { %506 = vmatpush2.bf16.msra.mxu0 %v1150_v42  ;;  %547 = vmatpush2.bf16.msra.mxu1 %v1151_v43  ;;  %v147_v40 = vsub.s32 0, %v146_v39  ;;  %v155_v41 = vsub.s32 2, %v146_v39  ;;  %v143_v42 = vld [vmem:[#allocation7] sm:$0xf]  ;;  %v151_v43 = vsub.s32 1, %v146_v39 }
  0x5f   :  { %507 = vmatprep.subr.bf16.mxu0 %v1152_v44  ;;  %548 = vmatprep.subr.bf16.mxu1 %v1154_v45  ;;  %v159_v44 = vsub.s32 3, %v146_v39 }
  0x60   :  { %v148_v45 = vrot.slane %v143_v42, %v147_v40 }
  0x61   :  { %v160_v48 = vrot.slane %v143_v42, %v159_v44 }
  0x62   :  { %508 = vmatpush2.bf16.msra.mxu0 %v1156_v46  ;;  %549 = vmatpush2.bf16.msra.mxu1 %v1157_v47  ;;  %v156_v46 = vrot.slane %v143_v42, %v155_v41  ;;  %v152_v47 = vrot.slane %v143_v42, %v151_v43 }
  0x63   :  { %509 = vmatprep.subr.bf16.mxu0 %v1158_v50  ;;  %550 = vmatprep.subr.bf16.mxu1 %v1160_v51 }
  0x66   :  { %510 = vmatpush2.bf16.msra.mxu0 %v1162_v53  ;;  %551 = vmatpush2.bf16.msra.mxu1 %v1163_v54 }
  0x67   :  { %511 = vmatprep.subr.bf16.mxu0 %v1164_v55  ;;  %552 = vmatprep.subr.bf16.mxu1 %v1166_v56 }
  0x6a   :  { %512 = vmatpush2.bf16.msra.mxu0 %v1168_v57  ;;  %553 = vmatpush2.bf16.msra.mxu1 %v1169_v58 }
  0x6b   :  { %513 = vmatprep.subr.bf16.mxu0 %v1170_v59  ;;  %554 = vmatprep.subr.bf16.mxu1 %v1172_v60 }
  0x6e   :  { %514 = vmatpush2.bf16.msra.mxu0 %v1174_v61  ;;  %555 = vmatpush2.bf16.msra.mxu1 %v1175_v62 }
  0x6f   :  { %515 = vmatprep.subr.bf16.mxu0 %v1176_v63  ;;  %556 = vmatprep.subr.bf16.mxu1 %v1178_v1 }
  0x72   :  { %516 = vmatpush2.bf16.msra.mxu0 %v1180_v2  ;;  %557 = vmatpush2.bf16.msra.mxu1 %v1181_v3 }
  0x73   :  { %1033 = vmatprep.subr.bf16.mxu0 %v1182_v5  ;;  %1055 = vmatprep.subr.bf16.mxu1 %v1183_v6 }
  0x75   :  { %518 = vmatmul.mubr.bf16.vlgmr.msra.gmra.mxu0 %v77_v8  ;;  %559 = vmatmul.mubr.bf16.vlgmr.msra.gmra.mxu1 %v77_v8 }
  0x76   :  { %1034 = vmatpush3.bf16.msra.mxu0 %v1184_v7  ;;  %1056 = vmatpush3.bf16.msra.mxu1 %v1185_v9  ;;  %v1000_v7 = vld [vmem:[%s1383_s4] ss:$0 sm:$0xff] }
  0x77   :  { %1035 = vmatprep.subr.bf16.mxu0 %v1186_v10  ;;  %1057 = vmatprep.subr.bf16.mxu1 %v1187_v11 }
  0x7a   :  { %1036 = vmatpush3.bf16.msra.mxu0 %v1188_v12  ;;  %1058 = vmatpush3.bf16.msra.mxu1 %v1189_v13 }
  0x7b   :  { %1037 = vmatprep.subr.bf16.mxu0 %v1190_v14  ;;  %1059 = vmatprep.subr.bf16.mxu1 %v1191_v15 }
  0x7e   :  { %1038 = vmatpush3.bf16.msra.mxu0 %v1192_v16  ;;  %1060 = vmatpush3.bf16.msra.mxu1 %v1193_v17 }
  0x7f   :  { %1039 = vmatprep.subr.bf16.mxu0 %v1194_v18  ;;  %1061 = vmatprep.subr.bf16.mxu1 %v1195_v19 }
  0x82   :  { %1040 = vmatpush3.bf16.msra.mxu0 %v1196_v20  ;;  %1062 = vmatpush3.bf16.msra.mxu1 %v1197_v21 }
  0x83   :  { %1041 = vmatprep.subr.bf16.mxu0 %v1198_v22  ;;  %1063 = vmatprep.subr.bf16.mxu1 %v1199_v23 }
  0x86   :  { %1042 = vmatpush3.bf16.msra.mxu0 %v1200_v24  ;;  %1064 = vmatpush3.bf16.msra.mxu1 %v1201_v25 }
  0x87   :  { %1043 = vmatprep.subr.bf16.mxu0 %v1202_v26  ;;  %1065 = vmatprep.subr.bf16.mxu1 %v1203_v27 }
  0x8a   :  { %1044 = vmatpush3.bf16.msra.mxu0 %v1204_v28  ;;  %1066 = vmatpush3.bf16.msra.mxu1 %v1205_v29 }
  0x8b   :  { %1045 = vmatprep.subr.bf16.mxu0 %v1206_v30  ;;  %1067 = vmatprep.subr.bf16.mxu1 %v1207_v31 }
  0x8e   :  { %1046 = vmatpush3.bf16.msra.mxu0 %v1208_v32  ;;  %1068 = vmatpush3.bf16.msra.mxu1 %v1209_v33 }
  0x8f   :  { %1047 = vmatprep.subr.bf16.mxu0 %v1210_v34  ;;  %1069 = vmatprep.subr.bf16.mxu1 %v1211_v35 }
  0x92   :  { %1048 = vmatpush3.bf16.msra.mxu0 %v1212_v36  ;;  %1070 = vmatpush3.bf16.msra.mxu1 %v1213_v37 }
 0x135   :  { %v519_v49 = vpop.f32.mrf.mxu0  ;;  %v560_v50 = vpop.f32.mrf.mxu1 }
 0x136   :  { %v520_v51 = vadd.f32 %v519_v49, %v148_v45  ;;  %v561_v52 = vadd.f32 %v560_v50, %v156_v46 }
 0x137   :  { %v521_v53 = vpop.f32.mrf.mxu0  ;;  %v562_v54 = vpop.f32.mrf.mxu1 }
 0x138   :  { %v569_v55 = vmax.f32 %v561_v52, 0.0  ;;  %v522_v56 = vadd.f32 %v521_v53, %v152_v47  ;;  %v563_v57 = vadd.f32 %v562_v54, %v160_v48  ;;  %v567_v58 = vmax.f32 %v520_v51, 0.0 }
 0x139   :  { %v523_v59 = vpop.f32.mrf.mxu0  ;;  %v564_v60 = vpop.f32.mrf.mxu1 }
 0x13a   :  { %v568_v61 = vmax.f32 %v522_v56, 0.0  ;;  %v570_v62 = vmax.f32 %v563_v57, 0.0  ;;  %v573_v63 = vpack.c.bf16 %v569_v55, %v569_v55  ;;  %v571_v4 = vpack.c.bf16 %v567_v58, %v567_v58 }
 0x13b   :  { %v524_v0 = vpop.f32.mrf.mxu0  ;;  %v565_v1 = vpop.f32.mrf.mxu1 }
 0x13c   :  { %v572_v2 = vpack.c.bf16 %v568_v61, %v568_v61  ;;  %v574_v3 = vpack.c.bf16 %v570_v62, %v570_v62 }
 0x13e   :  { %870 = vmatprep.mubr.bf16.mxu0 %v572_v2  ;;  %910 = vmatprep.mubr.bf16.mxu1 %v574_v3 }
 0x13f   :  { %871 = vmatmul.mubr.bf16.vlgmr.msra.gmra.mxu0 %v571_v4  ;;  %911 = vmatmul.mubr.bf16.vlgmr.msra.gmra.mxu1 %v573_v63 }
 0x1ff   :  { %v1049_v5 = vpop.f32.mrf.mxu0  ;;  %v1071_v6 = vpop.f32.mrf.mxu1 }
 0x201   :  { %v1050_v8 = vpop.f32.mrf.mxu0  ;;  %v1072_v9 = vpop.f32.mrf.mxu1 }
 0x202   :  { %v1051_v10 = vadd.f32 %v1050_v8, %v1049_v5  ;;  %v1073_v14 = vadd.f32 %v1072_v9, %v1071_v6 }
 0x203   :  { %v1052_v11 = vpop.f32.mrf.mxu0  ;;  %v1074_v12 = vpop.f32.mrf.mxu1 }
 0x204   :  { %v873_v13 = vadd.f32 %v1051_v10, %v1000_v7 }
 0x205   :  { %v1053_v15 = vpop.f32.mrf.mxu0  ;;  %v1075_v16 = vpop.f32.mrf.mxu1 }
 0x206   :  { %v913_v17 = vadd.f32 %v1073_v14, %v873_v13 }
 0x208   :  { %918 = vst [vmem:[#allocation10] sm:$0xff] %v913_v17 }
 0x209   :  { %1305 = shalt.err (!%p1302_p10)
}
 0x20a   :  { %928 = dma.vmem_to_hbm [thread:$0]  %s926_s16, 128, %s1384_s5, [#allocation4]  }
 0x20b   :  { %1320 = dma.done.wait [#allocation4], 128  }
 0x20c   :  { %1321 = vsyncadd [#allocation4], 4294967168 }
 0x20d   :  { %932 = vsyncpa [#allocation3], 1 }
 0x20e   :  { %933 = vsyncpa [#allocation6], 1 }
 0x20f   :  { %934 = vsyncpa [#allocation9], 1 }
 0x210   :  { %935 = vsyncpa [#allocation4], 1 }

</bundles_post_ra>
